<compile_context>
chip_gen: v7x
topology: tpu7x:2x2x1
jax: 0.10.0
libtpu: 0.0.40
codegen_flags: <defaults>
</compile_context>

<pallas_src>
import functools

import jax
import jax.numpy as jnp
from jax.experimental import pallas as pl
from jax.experimental.pallas import tpu as pltpu


def full_deep_set_kernel(x_ref, w1_ref, b1_ref, w2t_ref, b2_ref, out_ref, *,
                         set_size, set_size_padded):
    rows, _ = x_ref.shape                    # rows = tb * set_size_padded
    tb = rows // set_size_padded
    hidden = w1_ref.shape[1]

    # encoder: Linear(F, 64) + ReLU on the flattened rows (f32 MXU; K=F is tiny
    # so f32 costs nothing and keeps exact parity with the torch module)
    h = jnp.dot(x_ref[...], w1_ref[...], preferred_element_type=jnp.float32)
    h = jnp.maximum(h + b1_ref[...], 0.0)                        # (tb*Sp, 64)

    # zero out padded set rows (static branch; only present when S % 8 != 0)
    if set_size_padded != set_size:
        row = jax.lax.broadcasted_iota(jnp.int32, (rows, 1), 0)
        h = jnp.where((row % set_size_padded) < set_size, h, 0.0)

    # mean pool over the set dimension: per-batch sublane reduction.  Sp is a
    # multiple of 8 so the (tb, Sp, 64) f32 view is copy-free.
    pooled = jnp.sum(h.reshape(tb, set_size_padded, hidden), axis=1) * (1.0 / set_size)

    # decoder: Linear(64, 1) + Sigmoid, computed transposed so the result is
    # already lane-dense: (1,64) . (tb,64)^T -> (1, tb)
    logit = jax.lax.dot_general(
        w2t_ref[...], pooled,
        dimension_numbers=(((1,), (1,)), ((), ())),
        preferred_element_type=jnp.float32) + b2_ref[...]        # (1, tb)

    # numerically-stable sigmoid: exp goes to the EUP, no inf intermediate; the
    # divide only touches (1, tb) elements.
    e = jnp.exp(-jnp.abs(logit))
    num = jnp.where(logit >= 0.0, 1.0, e)
    out_ref[...] = num / (1.0 + e)


def init_params(key, input_features, hidden=64):
    """Params mimicking nn.Linear's U(-1/sqrt(fan_in), 1/sqrt(fan_in)).

    Encoder weight stored as (in, out) so the kernel computes x @ W + b; decoder
    weight kept in torch (out, in) layout (1, 64), which is exactly the
    transposed form the kernel needs for the lane-dense output.
    """
    k1, k2, k3, k4 = jax.random.split(key, 4)
    be = 1.0 / jnp.sqrt(float(input_features))
    w1 = jax.random.uniform(k1, (input_features, hidden), jnp.float32, -be, be)
    b1 = jax.random.uniform(k2, (1, hidden), jnp.float32, -be, be)
    bd = 1.0 / jnp.sqrt(float(hidden))
    w2t = jax.random.uniform(k3, (1, hidden), jnp.float32, -bd, bd)
    b2 = jax.random.uniform(k4, (1, 1), jnp.float32, -bd, bd)
    return (w1, b1, w2t, b2)


@functools.partial(jax.jit, static_argnames=("thres", "tb"))
def full_deep_set_forward(x, params, thres=0.5, tb=None):
    """Forward of FullDeepSet(pool='mean'). Returns (probs (B,1) f32, mask (B,1) bool)."""
    w1, b1, w2t, b2 = params
    B, S, F = x.shape
    H = w1.shape[1]

    # pad the set dim to a multiple of 8 so the in-kernel pooling view is
    # copy-free; padded rows are masked to zero in-kernel.
    Sp = ((S + 7) // 8) * 8

    # Batch tile: the kernel is per-grid-step-overhead bound at small tiles, so
    # run the whole batch in one step when it fits; otherwise use 4096-row
    # (multiple-of-128, lane-dense) tiles.  At S=8, H=64 a 4096-batch tile is
    # ~13 MiB of VMEM (x double-buffered + f32 h), under the 32 MiB scoped
    # default on v5e/v6e/v7x.
    if tb is None:
        tb = B if B <= 4096 else 4096
    n_tiles = pl.cdiv(B, tb)
    Bp = n_tiles * tb

    xp = x
    if Bp != B or Sp != S:
        xp = jnp.pad(x, ((0, Bp - B), (0, Sp - S), (0, 0)))
    xp = xp.reshape(Bp * Sp, F)           # flattened 2-D layout: contiguous DMAs

    flops = 2 * Bp * Sp * F * H + 2 * Bp * H
    bytes_accessed = Bp * Sp * F * 4 + F * H * 4 + (2 * H + 1) * 4 + Bp * 4

    probs_row = pl.pallas_call(
        functools.partial(full_deep_set_kernel, set_size=S, set_size_padded=Sp),
        out_shape=jax.ShapeDtypeStruct((1, Bp), jnp.float32),
        grid_spec=pltpu.PrefetchScalarGridSpec(
            num_scalar_prefetch=0,
            grid=(n_tiles,),
            in_specs=[
                pl.BlockSpec((tb * Sp, F), lambda i: (i, 0)),   # x rows: streamed per tile
                pl.BlockSpec((F, H), lambda i: (0, 0)),         # resident weights / biases
                pl.BlockSpec((1, H), lambda i: (0, 0)),
                pl.BlockSpec((1, H), lambda i: (0, 0)),
                pl.BlockSpec((1, 1), lambda i: (0, 0)),
            ],
            out_specs=pl.BlockSpec((1, tb), lambda i: (0, i)),  # lane-dense probs slab
        ),
        compiler_params=pltpu.CompilerParams(dimension_semantics=("parallel",)),
        cost_estimate=pl.CostEstimate(flops=flops, transcendentals=Bp,
                                      bytes_accessed=bytes_accessed),
    )(xp, w1, b1, w2t, b2)

    probs = probs_row[0, :B].reshape(B, 1)
    mask = probs >= thres                 # fused into the same jit as the kernel call
    return probs, mask


def reference_forward(x, params, thres=0.5):
    """Pure-JAX f32 reference (matches the torch module's math)."""
    w1, b1, w2t, b2 = params
    h = jnp.maximum(jnp.einsum('bsf,fk->bsk', x, w1, precision='highest') + b1, 0.0)
    pooled = h.mean(axis=1)
    logit = pooled @ w2t.T + b2
    p = jax.nn.sigmoid(logit)
    return p, p >= thres


if __name__ == "__main__":
    B, S, F = 64, 8, 16          # batch, set size, input_features (small test shapes)
    key = jax.random.PRNGKey(0)
    kx, kp = jax.random.split(key)
    x = jax.random.normal(kx, (B, S, F), jnp.float32)
    params = init_params(kp, F)

    probs, mask = full_deep_set_forward(x, params, thres=0.5)
    probs = jax.block_until_ready(probs)
    mask = jax.block_until_ready(mask)

    ref_probs, ref_mask = reference_forward(x, params, thres=0.5)
    assert probs.shape == (B, 1) and mask.shape == (B, 1) and mask.dtype == jnp.bool_
    assert jnp.allclose(probs, ref_probs, atol=1e-3, rtol=1e-3), \
        float(jnp.max(jnp.abs(probs - ref_probs)))
    # compare the threshold mask only where probs are not razor-thin at thres
    decisive = jnp.abs(ref_probs - 0.5) > 1e-3
    assert bool(jnp.all(jnp.where(decisive, mask == ref_mask, True)))

    print("KERNEL_OK")
</pallas_src>

<mosaic_0001>
module attributes {stable_mosaic.version = 11 : i64} {
  func.func @full_deep_set_kernel(%arg0: i32, %arg1: memref<512x16xf32, #tpu.memory_space<vmem>>, %arg2: memref<16x64xf32, #tpu.memory_space<vmem>>, %arg3: memref<1x64xf32, #tpu.memory_space<vmem>>, %arg4: memref<1x64xf32, #tpu.memory_space<vmem>>, %arg5: memref<1x1xf32, #tpu.memory_space<vmem>>, %arg6: memref<1x64xf32, #tpu.memory_space<vmem>>) attributes {dimension_semantics = [#tpu.dimension_semantics<parallel>], iteration_bounds = array<i64: 1>, scalar_prefetch = 0 : i64, scratch_operands = 0 : i64, tpu.core_type = #tpu.core_type<tc>, window_params = [{transform_indices = @transform_0, window_bounds = array<i64: 512, 16>}, {pipeline_mode = #tpu.pipeline_mode<synchronous>, transform_indices = @transform_1, window_bounds = array<i64: 16, 64>}, {pipeline_mode = #tpu.pipeline_mode<synchronous>, transform_indices = @transform_2, window_bounds = array<i64: 1, 64>}, {pipeline_mode = #tpu.pipeline_mode<synchronous>, transform_indices = @transform_3, window_bounds = array<i64: 1, 64>}, {pipeline_mode = #tpu.pipeline_mode<synchronous>, transform_indices = @transform_4, window_bounds = array<i64: 1, 1>}, {transform_indices = @transform_5, window_bounds = array<i64: 1, 64>}]} {
    %c0 = arith.constant 0 : index
    %c0_0 = arith.constant 0 : index
    %0 = vector.load %arg1[%c0, %c0_0] : memref<512x16xf32, #tpu.memory_space<vmem>>, vector<512x16xf32>
    %c0_1 = arith.constant 0 : index
    %c0_2 = arith.constant 0 : index
    %1 = vector.load %arg2[%c0_1, %c0_2] : memref<16x64xf32, #tpu.memory_space<vmem>>, vector<16x64xf32>
    %cst = arith.constant dense<0.000000e+00> : vector<512x64xf32>
    %2 = tpu.matmul %0, %1, %cst {dimension_numbers = #tpu.dot_dimension_numbers<[1], [0], [0], [1], [0, 0, 1, 1], [], []>} : vector<512x16xf32>, vector<16x64xf32>, vector<512x64xf32> -> vector<512x64xf32>
    %c0_3 = arith.constant 0 : index
    %c0_4 = arith.constant 0 : index
    %3 = vector.load %arg3[%c0_3, %c0_4] : memref<1x64xf32, #tpu.memory_space<vmem>>, vector<1x64xf32>
    %4 = vector.broadcast %3 : vector<1x64xf32> to vector<512x64xf32>
    %5 = arith.addf %2, %4 : vector<512x64xf32>
    %cst_5 = arith.constant 0.000000e+00 : f32
    %6 = vector.broadcast %cst_5 : f32 to vector<512x64xf32>
    %7 = arith.maximumf %5, %6 : vector<512x64xf32>
    %8 = vector.shape_cast %7 : vector<512x64xf32> to vector<64x8x64xf32>
    %cst_6 = arith.constant dense<0.000000e+00> : vector<64x64xf32>
    %9 = vector.multi_reduction <add>, %8, %cst_6 [1] : vector<64x8x64xf32> to vector<64x64xf32>
    %cst_7 = arith.constant 1.250000e-01 : f32
    %10 = vector.broadcast %cst_7 : f32 to vector<64x64xf32>
    %11 = arith.mulf %9, %10 : vector<64x64xf32>
    %c0_8 = arith.constant 0 : index
    %c0_9 = arith.constant 0 : index
    %12 = vector.load %arg4[%c0_8, %c0_9] : memref<1x64xf32, #tpu.memory_space<vmem>>, vector<1x64xf32>
    %cst_10 = arith.constant dense<0.000000e+00> : vector<1x64xf32>
    %13 = tpu.matmul %12, %11, %cst_10 {dimension_numbers = #tpu.dot_dimension_numbers<[1], [1], [0], [0], [0, 0, 1, 0], [], []>} : vector<1x64xf32>, vector<64x64xf32>, vector<1x64xf32> -> vector<1x64xf32>
    %c0_11 = arith.constant 0 : index
    %c0_12 = arith.constant 0 : index
    %14 = vector.load %arg5[%c0_11, %c0_12] : memref<1x1xf32, #tpu.memory_space<vmem>>, vector<1x1xf32>
    %15 = vector.broadcast %14 : vector<1x1xf32> to vector<1x64xf32>
    %16 = arith.addf %13, %15 : vector<1x64xf32>
    %17 = math.absf %16 : vector<1x64xf32>
    %cst_13 = arith.constant 0.000000e+00 : f32
    %18 = vector.broadcast %cst_13 : f32 to vector<1x64xf32>
    %19 = arith.subf %18, %17 : vector<1x64xf32>
    %20 = math.exp %19 : vector<1x64xf32>
    %cst_14 = arith.constant 0.000000e+00 : f32
    %21 = vector.broadcast %cst_14 : f32 to vector<1x64xf32>
    %22 = arith.cmpf oge, %16, %21 : vector<1x64xf32>
    %cst_15 = arith.constant 1.000000e+00 : f32
    %23 = vector.broadcast %cst_15 : f32 to vector<1x64xf32>
    %24 = arith.select %22, %23, %20 : vector<1x64xi1>, vector<1x64xf32>
    %cst_16 = arith.constant 1.000000e+00 : f32
    %25 = vector.broadcast %cst_16 : f32 to vector<1x64xf32>
    %26 = arith.addf %25, %20 : vector<1x64xf32>
    %27 = arith.divf %24, %26 : vector<1x64xf32>
    %c0_17 = arith.constant 0 : index
    %c0_18 = arith.constant 0 : index
    %28 = vector.load %arg6[%c0_17, %c0_18] : memref<1x64xf32, #tpu.memory_space<vmem>>, vector<1x64xf32>
    tpu.vector_store %arg6[%c0_17, %c0_18], %27 {strides = array<i32>} : memref<1x64xf32, #tpu.memory_space<vmem>>, vector<1x64xf32>,
    return
  }
  func.func @transform_0(%arg0: i32) -> (i32, i32) {
    %c0_i32 = arith.constant 0 : i32
    %c0_i32_0 = arith.constant 0 : i32
    return %arg0, %c0_i32 : i32, i32
  }
  func.func @transform_1(%arg0: i32) -> (i32, i32) {
    %c0_i32 = arith.constant 0 : i32
    %c0_i32_0 = arith.constant 0 : i32
    %c0_i32_1 = arith.constant 0 : i32
    return %c0_i32, %c0_i32_0 : i32, i32
  }
  func.func @transform_2(%arg0: i32) -> (i32, i32) {
    %c0_i32 = arith.constant 0 : i32
    %c0_i32_0 = arith.constant 0 : i32
    %c0_i32_1 = arith.constant 0 : i32
    return %c0_i32, %c0_i32_0 : i32, i32
  }
  func.func @transform_3(%arg0: i32) -> (i32, i32) {
    %c0_i32 = arith.constant 0 : i32
    %c0_i32_0 = arith.constant 0 : i32
    %c0_i32_1 = arith.constant 0 : i32
    return %c0_i32, %c0_i32_0 : i32, i32
  }
  func.func @transform_4(%arg0: i32) -> (i32, i32) {
    %c0_i32 = arith.constant 0 : i32
    %c0_i32_0 = arith.constant 0 : i32
    %c0_i32_1 = arith.constant 0 : i32
    return %c0_i32, %c0_i32_0 : i32, i32
  }
  func.func @transform_5(%arg0: i32) -> (i32, i32) {
    %c0_i32 = arith.constant 0 : i32
    %c0_i32_0 = arith.constant 0 : i32
    return %c0_i32, %arg0 : i32, i32
  }
}

</mosaic_0001>

<bundles_post_ra>
// kernel: full_deep_set_forward.1
= control target key start
LH: loop header
LB: loop body
LE: loop exit
PB: predicated region body
PF: predicated region fallthrough
CT: control target
= control target key end

     0   :  { %vm95_vm0 = vcmask 130048   ;;  %vm737_vm1 = vcmask 523264   ;;  %vm1325_vm2 = vcmask 1041409   ;;  %vm1327_vm3 = vcmask 1042434   ;;  %s2541_s1 = inlined_call_operand.vmem [shape: f32[16,64], index: 1, kind: input, shape index: {}]   ;;  %s2542_s0 = inlined_call_operand.vmem [shape: f32[512,16], index: 0, kind: input, shape index: {}]   ;;  %s2543_s2 = inlined_call_operand.vmem [shape: f32[1,64], index: 2, kind: input, shape index: {}]   ;;  %s2544_s4 = inlined_call_operand.<no memory space> [shape: f32[1,1], index: 4, kind: input, shape index: {}]   ;;  %s2545_s3 = inlined_call_operand.vmem [shape: f32[1,64], index: 3, kind: input, shape index: {}]   ;;  %s2546_s5 = inlined_call_operand.vmem [shape: f32[1,64], index: 5, kind: output, shape index: {}]  }
   0x1   :  { %v86_v0 = vld [vmem:[%s2541_s1] sm:$0xff]  ;;  %v87_v1 = vld [vmem:[%s2541_s1 + $0x8] sm:$0xff]  ;;  %v56_v4 = vld [vmem:[%s2542_s0 + $0x110] sm:$0xff]  ;;  %vm1329_vm4 = vcmask 1043459   ;;  %vm1331_vm5 = vcmask 1044484   ;;  %vm1333_vm6 = vcmask 1045509  }
   0x2   :  { %v22_v2 = vld [vmem:[%s2542_s0] sm:$0xff]  ;;  %v1760_v3 = vpack.c.bf16 %v87_v1, %v86_v0  ;;  %1696 = vmatprep.mubr.msk.f32.mxu1 %vm95_vm0, %v56_v4  ;;  %v23_v5 = vld [vmem:[%s2542_s0 + $0x8] sm:$0xff]  ;;  %v57_v6 = vld [vmem:[%s2542_s0 + $0x118] sm:$0xff]  ;;  %vm1335_vm7 = vcmask 1046534   ;;  %vm1337_vm8 = vcmask 1047559   ;;  %vm1793_vm10 = vmmov 0  }
   0x3   :  { %1645 = vmatprep.mubr.msk.f32.mxu0 %vm95_vm0, %v22_v2  ;;  %v24_v7 = vld [vmem:[%s2542_s0 + $0x10] sm:$0xff]  ;;  %v58_v8 = vld [vmem:[%s2542_s0 + $0x120] sm:$0xff]  ;;  %v25_v9 = vld [vmem:[%s2542_s0 + $0x18] sm:$0xff]  ;;  %vm1486_vm12 = vcmask 516096  }
   0x4   :  { %1761 = vmatprep.subr.bf16.mxu0 %v1760_v3  ;;  %1780 = vmatprep.subr.bf16.mxu1 %v1760_v3  ;;  %v59_v10 = vld [vmem:[%s2542_s0 + $0x128] sm:$0xff]  ;;  %v26_v11 = vld [vmem:[%s2542_s0 + $0x20] sm:$0xff]  ;;  %v60_v12 = vld [vmem:[%s2542_s0 + $0x130] sm:$0xff] }
   0x5   :  { %1763 = vmatpush3.bf16.msra.mxu0 %v1760_v3  ;;  %1781 = vmatpush3.bf16.msra.mxu1 %v1760_v3  ;;  %v27_v13 = vld [vmem:[%s2542_s0 + $0x28] sm:$0xff]  ;;  %v61_v14 = vld [vmem:[%s2542_s0 + $0x138] sm:$0xff]  ;;  %v28_v15 = vld [vmem:[%s2542_s0 + $0x30] sm:$0xff]  ;;  %v2547_v3 = vmov 0.0|0.0  }
   0x6   :  { %v62_v16 = vld [vmem:[%s2542_s0 + $0x140] sm:$0xff]  ;;  %v29_v17 = vld [vmem:[%s2542_s0 + $0x38] sm:$0xff]  ;;  %v63_v18 = vld [vmem:[%s2542_s0 + $0x148] sm:$0xff]  ;;  %1764 = vmatprep.subr.bf16.mxu1 %v2547_v3 }
   0x7   :  { %v30_v19 = vld [vmem:[%s2542_s0 + $0x40] sm:$0xff]  ;;  %v64_v20 = vld [vmem:[%s2542_s0 + $0x150] sm:$0xff]  ;;  %v31_v21 = vld [vmem:[%s2542_s0 + $0x48] sm:$0xff] }
   0x8   :  { %1646 = vmatmul.mubr.msk.f32.vlgmr.msra.gmra.mrb[0].mxu0 %vm95_vm0, %v23_v5  ;;  %1697 = vmatmul.mubr.msk.f32.vlgmr.msra.gmra.mrb[0].mxu1 %vm95_vm0, %v57_v6  ;;  %v65_v22 = vld [vmem:[%s2542_s0 + $0x158] sm:$0xff]  ;;  %v32_v23 = vld [vmem:[%s2542_s0 + $0x50] sm:$0xff]  ;;  %v66_v24 = vld [vmem:[%s2542_s0 + $0x160] sm:$0xff] }
   0x9   :  { %1648 = vmatprep.mubr.msk.f32.mxu0 %vm95_vm0, %v24_v7  ;;  %1699 = vmatprep.mubr.msk.f32.mxu1 %vm95_vm0, %v58_v8  ;;  %v33_v25 = vld [vmem:[%s2542_s0 + $0x58] sm:$0xff]  ;;  %v67_v26 = vld [vmem:[%s2542_s0 + $0x168] sm:$0xff]  ;;  %v34_v27 = vld [vmem:[%s2542_s0 + $0x60] sm:$0xff] }
   0xa   :  { %v68_v28 = vld [vmem:[%s2542_s0 + $0x170] sm:$0xff]  ;;  %v35_v29 = vld [vmem:[%s2542_s0 + $0x68] sm:$0xff]  ;;  %v69_v30 = vld [vmem:[%s2542_s0 + $0x178] sm:$0xff] }
   0xb   :  { %v36_v31 = vld [vmem:[%s2542_s0 + $0x70] sm:$0xff]  ;;  %v70_v32 = vld [vmem:[%s2542_s0 + $0x180] sm:$0xff]  ;;  %v37_v33 = vld [vmem:[%s2542_s0 + $0x78] sm:$0xff] }
   0xc   :  { %1649 = vmatmul.mubr.msk.f32.gmra.mrb[2].mxu0 %vm95_vm0, %v25_v9  ;;  %1700 = vmatmul.mubr.msk.f32.gmra.mrb[2].mxu1 %vm95_vm0, %v59_v10  ;;  %v71_v34 = vld [vmem:[%s2542_s0 + $0x188] sm:$0xff]  ;;  %v38_v35 = vld [vmem:[%s2542_s0 + $0x80] sm:$0xff]  ;;  %v72_v36 = vld [vmem:[%s2542_s0 + $0x190] sm:$0xff] }
   0xd   :  { %1651 = vmatprep.mubr.msk.f32.mxu0 %vm95_vm0, %v26_v11  ;;  %1702 = vmatprep.mubr.msk.f32.mxu1 %vm95_vm0, %v60_v12  ;;  %v39_v37 = vld [vmem:[%s2542_s0 + $0x88] sm:$0xff]  ;;  %v73_v38 = vld [vmem:[%s2542_s0 + $0x198] sm:$0xff]  ;;  %v40_v39 = vld [vmem:[%s2542_s0 + $0x90] sm:$0xff] }
   0xe   :  { %v74_v40 = vld [vmem:[%s2542_s0 + $0x1a0] sm:$0xff]  ;;  %v41_v41 = vld [vmem:[%s2542_s0 + $0x98] sm:$0xff]  ;;  %v75_v42 = vld [vmem:[%s2542_s0 + $0x1a8] sm:$0xff] }
   0xf   :  { %v42_v43 = vld [vmem:[%s2542_s0 + $0xa0] sm:$0xff]  ;;  %v76_v44 = vld [vmem:[%s2542_s0 + $0x1b0] sm:$0xff]  ;;  %v43_v45 = vld [vmem:[%s2542_s0 + $0xa8] sm:$0xff] }
  0x10   :  { %1652 = vmatmul.mubr.msk.f32.gmra.mrb[4].mxu0 %vm95_vm0, %v27_v13  ;;  %1703 = vmatmul.mubr.msk.f32.gmra.mrb[4].mxu1 %vm95_vm0, %v61_v14  ;;  %v77_v46 = vld [vmem:[%s2542_s0 + $0x1b8] sm:$0xff]  ;;  %v44_v47 = vld [vmem:[%s2542_s0 + $0xb0] sm:$0xff]  ;;  %v78_v48 = vld [vmem:[%s2542_s0 + $0x1c0] sm:$0xff] }
  0x11   :  { %1654 = vmatprep.mubr.msk.f32.mxu0 %vm95_vm0, %v28_v15  ;;  %1705 = vmatprep.mubr.msk.f32.mxu1 %vm95_vm0, %v62_v16  ;;  %v45_v49 = vld [vmem:[%s2542_s0 + $0xb8] sm:$0xff]  ;;  %v79_v50 = vld [vmem:[%s2542_s0 + $0x1c8] sm:$0xff]  ;;  %v46_v51 = vld [vmem:[%s2542_s0 + $0xc0] sm:$0xff] }
  0x12   :  { %v80_v52 = vld [vmem:[%s2542_s0 + $0x1d0] sm:$0xff]  ;;  %v47_v53 = vld [vmem:[%s2542_s0 + $0xc8] sm:$0xff]  ;;  %v81_v54 = vld [vmem:[%s2542_s0 + $0x1d8] sm:$0xff] }
  0x13   :  { %v48_v55 = vld [vmem:[%s2542_s0 + $0xd0] sm:$0xff]  ;;  %v82_v56 = vld [vmem:[%s2542_s0 + $0x1e0] sm:$0xff]  ;;  %v49_v57 = vld [vmem:[%s2542_s0 + $0xd8] sm:$0xff] }
  0x14   :  { %1655 = vmatmul.mubr.msk.f32.gmra.mrb[6].mxu0 %vm95_vm0, %v29_v17  ;;  %1706 = vmatmul.mubr.msk.f32.gmra.mrb[6].mxu1 %vm95_vm0, %v63_v18  ;;  %v83_v58 = vld [vmem:[%s2542_s0 + $0x1e8] sm:$0xff]  ;;  %v50_v59 = vld [vmem:[%s2542_s0 + $0xe0] sm:$0xff]  ;;  %v84_v60 = vld [vmem:[%s2542_s0 + $0x1f0] sm:$0xff] }
  0x15   :  { %1657 = vmatprep.mubr.msk.f32.mxu0 %vm95_vm0, %v30_v19  ;;  %1708 = vmatprep.mubr.msk.f32.mxu1 %vm95_vm0, %v64_v20  ;;  %v51_v61 = vld [vmem:[%s2542_s0 + $0xe8] sm:$0xff]  ;;  %v85_v62 = vld [vmem:[%s2542_s0 + $0x1f8] sm:$0xff]  ;;  %v52_v63 = vld [vmem:[%s2542_s0 + $0xf0] sm:$0xff] }
  0x16   :  { %v53_v0 = vld [vmem:[%s2542_s0 + $0xf8] sm:$0xff]  ;;  %v54_v1 = vld [vmem:[%s2542_s0 + $0x100] sm:$0xff]  ;;  %v55_v2 = vld [vmem:[%s2542_s0 + $0x108] sm:$0xff] }
  0x17   :  { %v2092_v4 = vld [vmem:[%s2543_s2] ss:$0 sm:$0xff]  ;;  %vm2408_vm9 = vmpackc.low %vm737_vm1, %vm737_vm1 }
  0x18   :  { %1658 = vmatmul.mubr.msk.f32.gmra.mrb[8].mxu0 %vm95_vm0, %v31_v21  ;;  %1709 = vmatmul.mubr.msk.f32.gmra.mrb[8].mxu1 %vm95_vm0, %v65_v22 }
  0x19   :  { %1660 = vmatprep.mubr.msk.f32.mxu0 %vm95_vm0, %v32_v23  ;;  %1711 = vmatprep.mubr.msk.f32.mxu1 %vm95_vm0, %v66_v24 }
  0x1c   :  { %1661 = vmatmul.mubr.msk.f32.gmra.mrb[10].mxu0 %vm95_vm0, %v33_v25  ;;  %1712 = vmatmul.mubr.msk.f32.gmra.mrb[10].mxu1 %vm95_vm0, %v67_v26 }
  0x1d   :  { %1663 = vmatprep.mubr.msk.f32.mxu0 %vm95_vm0, %v34_v27  ;;  %1714 = vmatprep.mubr.msk.f32.mxu1 %vm95_vm0, %v68_v28 }
  0x20   :  { %1664 = vmatmul.mubr.msk.f32.gmra.mrb[12].mxu0 %vm95_vm0, %v35_v29  ;;  %1715 = vmatmul.mubr.msk.f32.gmra.mrb[12].mxu1 %vm95_vm0, %v69_v30 }
  0x21   :  { %1666 = vmatprep.mubr.msk.f32.mxu0 %vm95_vm0, %v36_v31  ;;  %1717 = vmatprep.mubr.msk.f32.mxu1 %vm95_vm0, %v70_v32 }
  0x24   :  { %1667 = vmatmul.mubr.msk.f32.gmra.mrb[14].mxu0 %vm95_vm0, %v37_v33  ;;  %1718 = vmatmul.mubr.msk.f32.gmra.mrb[14].mxu1 %vm95_vm0, %v71_v34 }
  0x25   :  { %1669 = vmatprep.mubr.msk.f32.mxu0 %vm95_vm0, %v38_v35  ;;  %1720 = vmatprep.mubr.msk.f32.mxu1 %vm95_vm0, %v72_v36 }
  0x28   :  { %1670 = vmatmul.mubr.msk.f32.gmra.mrb[16].mxu0 %vm95_vm0, %v39_v37  ;;  %1721 = vmatmul.mubr.msk.f32.gmra.mrb[16].mxu1 %vm95_vm0, %v73_v38 }
  0x29   :  { %1672 = vmatprep.mubr.msk.f32.mxu0 %vm95_vm0, %v40_v39  ;;  %1723 = vmatprep.mubr.msk.f32.mxu1 %vm95_vm0, %v74_v40 }
  0x2c   :  { %1673 = vmatmul.mubr.msk.f32.gmra.mrb[18].mxu0 %vm95_vm0, %v41_v41  ;;  %1724 = vmatmul.mubr.msk.f32.gmra.mrb[18].mxu1 %vm95_vm0, %v75_v42 }
  0x2d   :  { %1675 = vmatprep.mubr.msk.f32.mxu0 %vm95_vm0, %v42_v43  ;;  %1726 = vmatprep.mubr.msk.f32.mxu1 %vm95_vm0, %v76_v44 }
  0x30   :  { %1676 = vmatmul.mubr.msk.f32.gmra.mrb[20].mxu0 %vm95_vm0, %v43_v45  ;;  %1727 = vmatmul.mubr.msk.f32.gmra.mrb[20].mxu1 %vm95_vm0, %v77_v46 }
  0x31   :  { %1678 = vmatprep.mubr.msk.f32.mxu0 %vm95_vm0, %v44_v47  ;;  %1729 = vmatprep.mubr.msk.f32.mxu1 %vm95_vm0, %v78_v48 }
  0x34   :  { %1679 = vmatmul.mubr.msk.f32.gmra.mrb[22].mxu0 %vm95_vm0, %v45_v49  ;;  %1730 = vmatmul.mubr.msk.f32.gmra.mrb[22].mxu1 %vm95_vm0, %v79_v50 }
  0x35   :  { %1681 = vmatprep.mubr.msk.f32.mxu0 %vm95_vm0, %v46_v51  ;;  %1732 = vmatprep.mubr.msk.f32.mxu1 %vm95_vm0, %v80_v52 }
  0x38   :  { %1682 = vmatmul.mubr.msk.f32.gmra.mrb[24].mxu0 %vm95_vm0, %v47_v53  ;;  %1733 = vmatmul.mubr.msk.f32.gmra.mrb[24].mxu1 %vm95_vm0, %v81_v54 }
  0x39   :  { %1684 = vmatprep.mubr.msk.f32.mxu0 %vm95_vm0, %v48_v55  ;;  %1735 = vmatprep.mubr.msk.f32.mxu1 %vm95_vm0, %v82_v56 }
  0x3c   :  { %1685 = vmatmul.mubr.msk.f32.gmra.mrb[26].mxu0 %vm95_vm0, %v49_v57  ;;  %1736 = vmatmul.mubr.msk.f32.gmra.mrb[26].mxu1 %vm95_vm0, %v83_v58 }
  0x3d   :  { %1687 = vmatprep.mubr.msk.f32.mxu0 %vm95_vm0, %v50_v59  ;;  %1738 = vmatprep.mubr.msk.f32.mxu1 %vm95_vm0, %v84_v60 }
  0x40   :  { %1688 = vmatmul.mubr.msk.f32.gmra.mrb[28].mxu0 %vm95_vm0, %v51_v61  ;;  %1739 = vmatmul.mubr.msk.f32.gmra.mrb[28].mxu1 %vm95_vm0, %v85_v62 }
  0x41   :  { %1690 = vmatprep.mubr.msk.f32.mxu0 %vm95_vm0, %v52_v63 }
  0x44   :  { %1691 = vmatmul.mubr.msk.f32.gmra.mrb[30].mxu0 %vm95_vm0, %v53_v0 }
  0x45   :  { %1693 = vmatprep.mubr.msk.f32.mxu0 %vm95_vm0, %v54_v1 }
  0x48   :  { %1694 = vmatmul.mubr.msk.f32.gmra.mrb[32].mxu0 %vm95_vm0, %v55_v2 }
  0xdb   :  { %v1647_v5 = vpop.f32.mrb[0].mxu0  ;;  %v2094_v6 = vpop.f32.mrb[0].mxu1 }
  0xdc   :  { %v360_v7 = vadd.f32 %v1647_v5, %v2092_v4  ;;  %v354_v8 = vpop.f32.mrb[1].mxu0  ;;  %v2097_v9 = vpop.f32.mrb[1].mxu1 }
  0xdd   :  { %v355_v10 = vadd.f32 %v2092_v4, %v354_v8 }
  0xde   :  { %v674_v11 = vmax.f32 %v360_v7, 0.0 }
  0xdf   :  { %v673_v12 = vmax.f32 %v355_v10, 0.0  ;;  %v1650_v13 = vpop.f32.mrb[2].mxu0  ;;  %v2100_v14 = vpop.f32.mrb[2].mxu1 }
  0xe0   :  { %v745_v15 = vsel %vm737_vm1, %v674_v11, 0.0  ;;  %v370_v16 = vadd.f32 %v1650_v13, %v2092_v4  ;;  %v364_v17 = vpop.f32.mrb[3].mxu0  ;;  %v2104_v18 = vpop.f32.mrb[3].mxu1 }
  0xe1   :  { %v746_v19 = vrot.slane %v745_v15, 4  ;;  %v738_v20 = vsel %vm737_vm1, %v673_v12, 0.0  ;;  %v365_v21 = vadd.f32 %v2092_v4, %v364_v17 }
  0xe2   :  { %v739_v22 = vrot.slane %v738_v20, 4  ;;  %v676_v23 = vmax.f32 %v370_v16, 0.0 }
  0xe3   :  { %v747_v24 = vadd.f32 %v746_v19, %v745_v15  ;;  %v675_v25 = vmax.f32 %v365_v21, 0.0  ;;  %v1653_v26 = vpop.f32.mrb[4].mxu0  ;;  %v2108_v27 = vpop.f32.mrb[4].mxu1 }
  0xe4   :  { %v740_v28 = vadd.f32 %v739_v22, %v738_v20  ;;  %v759_v29 = vsel %vm737_vm1, %v676_v23, 0.0  ;;  %v380_v30 = vadd.f32 %v1653_v26, %v2092_v4  ;;  %v374_v31 = vpop.f32.mrb[5].mxu0  ;;  %v2112_v32 = vpop.f32.mrb[5].mxu1 }
  0xe5   :  { %v748_v33 = vrot.slane %v747_v24, 2  ;;  %v760_v34 = vrot.slane %v759_v29, 4  ;;  %v752_v35 = vsel %vm737_vm1, %v675_v25, 0.0  ;;  %v375_v36 = vadd.f32 %v2092_v4, %v374_v31 }
  0xe6   :  { %v741_v37 = vrot.slane %v740_v28, 2  ;;  %v753_v38 = vrot.slane %v752_v35, 4  ;;  %v678_v39 = vmax.f32 %v380_v30, 0.0 }
  0xe7   :  { %v749_v40 = vadd.f32 %v748_v33, %v747_v24  ;;  %v761_v41 = vadd.f32 %v760_v34, %v759_v29  ;;  %v677_v42 = vmax.f32 %v375_v36, 0.0  ;;  %v1656_v43 = vpop.f32.mrb[6].mxu0  ;;  %v2116_v44 = vpop.f32.mrb[6].mxu1 }
  0xe8   :  { %v742_v45 = vadd.f32 %v741_v37, %v740_v28  ;;  %v754_v46 = vadd.f32 %v753_v38, %v752_v35  ;;  %v773_v47 = vsel %vm737_vm1, %v678_v39, 0.0  ;;  %v384_v48 = vpop.f32.mrb[7].mxu0  ;;  %v2119_v49 = vpop.f32.mrb[7].mxu1  ;;  %v390_v30 = vadd.f32 %v1656_v43, %v2092_v4 }
  0xe9   :  { %v750_v50 = vrot.slane %v749_v40, 1  ;;  %v762_v51 = vrot.slane %v761_v41, 2  ;;  %v774_v52 = vrot.slane %v773_v47, 4  ;;  %v766_v53 = vsel %vm737_vm1, %v677_v42, 0.0 }
  0xea   :  { %v743_v54 = vrot.slane %v742_v45, 1  ;;  %v755_v55 = vrot.slane %v754_v46, 2  ;;  %v767_v56 = vrot.slane %v766_v53, 4  ;;  %v385_v60 = vadd.f32 %v2092_v4, %v384_v48 }
  0xeb   :  { %v751_v57 = vadd.f32 %v750_v50, %v749_v40  ;;  %v763_v58 = vadd.f32 %v762_v51, %v761_v41  ;;  %v775_v59 = vadd.f32 %v774_v52, %v773_v47  ;;  %v1659_v61 = vpop.f32.mrb[8].mxu0  ;;  %v2123_v62 = vpop.f32.mrb[8].mxu1  ;;  %v680_v52 = vmax.f32 %v390_v30, 0.0 }
  0xec   :  { %v744_v63 = vadd.f32 %v743_v54, %v742_v45  ;;  %v756_v0 = vadd.f32 %v755_v55, %v754_v46  ;;  %v768_v1 = vadd.f32 %v767_v56, %v766_v53  ;;  %v394_v2 = vpop.f32.mrb[9].mxu0  ;;  %v2125_v5 = vpop.f32.mrb[9].mxu1  ;;  %v679_v15 = vmax.f32 %v385_v60, 0.0 }
  0xed   :  { %v1187_v7 = vmul.f32 0.125, %v751_v57  ;;  %v764_v8 = vrot.slane %v763_v58, 1  ;;  %v776_v10 = vrot.slane %v775_v59, 2  ;;  %v400_v19 = vadd.f32 %v1659_v61, %v2092_v4 }
  0xee   :  { %v1186_v11 = vmul.f32 0.125, %v744_v63  ;;  %v757_v12 = vrot.slane %v756_v0, 1  ;;  %v769_v13 = vrot.slane %v768_v1, 2  ;;  %v780_v25 = vsel %vm737_vm1, %v679_v15, 0.0 }
  0xef   :  { %v765_v16 = vadd.f32 %v764_v8, %v763_v58  ;;  %v777_v17 = vadd.f32 %v776_v10, %v775_v59  ;;  %v1662_v20 = vpop.f32.mrb[10].mxu0  ;;  %v2128_v21 = vpop.f32.mrb[10].mxu1  ;;  %v781_v31 = vrot.slane %v780_v25, 4  ;;  %v682_v35 = vmax.f32 %v400_v19, 0.0 }
  0xf0   :  { %v1326_v22 = vsel %vm1325_vm2, %v1187_v7, %v1186_v11  ;;  %v758_v23 = vadd.f32 %v757_v12, %v756_v0  ;;  %v770_v24 = vadd.f32 %v769_v13, %v768_v1  ;;  %v404_v26 = vpop.f32.mrb[11].mxu0  ;;  %v2132_v28 = vpop.f32.mrb[11].mxu1  ;;  %v395_v36 = vadd.f32 %v2092_v4, %v394_v2 }
  0xf1   :  { %v778_v29 = vrot.slane %v777_v17, 1  ;;  %v1189_v37 = vmul.f32 0.125, %v765_v16  ;;  %v782_v39 = vadd.f32 %v781_v31, %v780_v25  ;;  %v410_v40 = vadd.f32 %v1662_v20, %v2092_v4 }
  0xf2   :  { %v1188_v33 = vmul.f32 0.125, %v758_v23  ;;  %v771_v34 = vrot.slane %v770_v24, 1  ;;  %v801_v43 = vsel %vm737_vm1, %v682_v35, 0.0  ;;  %v681_v47 = vmax.f32 %v395_v36, 0.0 }
  0xf3   :  { %v779_v38 = vadd.f32 %v778_v29, %v777_v17  ;;  %v1665_v41 = vpop.f32.mrb[12].mxu0  ;;  %v2137_v42 = vpop.f32.mrb[12].mxu1  ;;  %v783_v53 = vrot.slane %v782_v39, 2  ;;  %v802_v55 = vrot.slane %v801_v43, 4  ;;  %v684_v57 = vmax.f32 %v410_v40, 0.0 }
  0xf4   :  { %v1328_v45 = vsel %vm1327_vm3, %v1188_v33, %v1326_v22  ;;  %v772_v46 = vadd.f32 %v771_v34, %v770_v24  ;;  %v414_v48 = vpop.f32.mrb[13].mxu0  ;;  %v2141_v50 = vpop.f32.mrb[13].mxu1  ;;  %v794_v56 = vsel %vm737_vm1, %v681_v47, 0.0  ;;  %v405_v61 = vadd.f32 %v2092_v4, %v404_v26 }
  0xf5   :  { %v1330_v51 = vsel %vm1329_vm4, %v1189_v37, %v1328_v45  ;;  %v1191_v58 = vmul.f32 0.125, %v779_v38  ;;  %v784_v59 = vadd.f32 %v783_v53, %v782_v39  ;;  %v795_v60 = vrot.slane %v794_v56, 4 }
  0xf6   :  { %v1190_v54 = vmul.f32 0.125, %v772_v46  ;;  %v803_v2 = vadd.f32 %v802_v55, %v801_v43  ;;  %v815_v7 = vsel %vm737_vm1, %v684_v57, 0.0  ;;  %v420_v8 = vadd.f32 %v1665_v41, %v2092_v4 }
  0xf7   :  { %v1668_v63 = vpop.f32.mrb[14].mxu0  ;;  %v2146_v0 = vpop.f32.mrb[14].mxu1  ;;  %v785_v12 = vrot.slane %v784_v59, 1  ;;  %v796_v15 = vadd.f32 %v795_v60, %v794_v56  ;;  %v2156_v16 = vadd.f32 %v2094_v6, %v2092_v4  ;;  %v816_v19 = vrot.slane %v815_v7, 4 }
  0xf8   :  { %v1332_v1 = vsel %vm1331_vm5, %v1190_v54, %v1330_v51  ;;  %v424_v10 = vpop.f32.mrb[15].mxu0  ;;  %v2151_v11 = vpop.f32.mrb[15].mxu1  ;;  %v804_v17 = vrot.slane %v803_v2, 2  ;;  %v683_v20 = vmax.f32 %v405_v61, 0.0  ;;  %v686_v22 = vmax.f32 %v420_v8, 0.0 }
  0xf9   :  { %v1334_v13 = vsel %vm1333_vm6, %v1191_v58, %v1332_v1  ;;  %v787_v23 = vsel %vm737_vm1, %v680_v52, 0.0  ;;  %v786_v24 = vadd.f32 %v785_v12, %v784_v59  ;;  %v797_v25 = vrot.slane %v796_v15, 2 }
  0xfa   :  { %v415_v26 = vadd.f32 %v2092_v4, %v414_v48  ;;  %v805_v31 = vadd.f32 %v804_v17, %v803_v2  ;;  %v817_v33 = vadd.f32 %v816_v19, %v815_v7  ;;  %v808_v34 = vsel %vm737_vm1, %v683_v20, 0.0 }
  0xfb   :  { %v2160_v29 = vpop.f32.mrb[16].mxu0  ;;  %v2162_v30 = vpop.f32.mrb[16].mxu1  ;;  %v829_v6 = vsel %vm737_vm1, %v686_v22, 0.0  ;;  %v1192_v37 = vmul.f32 0.125, %v786_v24  ;;  %v798_v38 = vadd.f32 %v797_v25, %v796_v15  ;;  %v809_v39 = vrot.slane %v808_v34, 4 }
  0xfc   :  { %v2166_v35 = vpop.f32.mrb[17].mxu0  ;;  %v2168_v36 = vpop.f32.mrb[17].mxu1  ;;  %v830_v40 = vrot.slane %v829_v6, 4  ;;  %v806_v41 = vrot.slane %v805_v31, 1  ;;  %v818_v45 = vrot.slane %v817_v33, 2  ;;  %v685_v46 = vmax.f32 %v415_v26, 0.0 }
  0xfd   :  { %v525_v43 = vadd.f32 %v2092_v4, %v2097_v9  ;;  %v2173_v47 = vsel %vm1335_vm7, %v1192_v37, %v1334_v13  ;;  %v799_v48 = vrot.slane %v798_v38, 1  ;;  %v810_v51 = vadd.f32 %v809_v39, %v808_v34 }
  0xfe   :  { %v831_v52 = vadd.f32 %v830_v40, %v829_v6  ;;  %v788_v55 = vrot.slane %v787_v23, 4  ;;  %v807_v56 = vadd.f32 %v806_v41, %v805_v31  ;;  %v819_v57 = vadd.f32 %v818_v45, %v817_v33 }
  0xff   :  { %v2175_v53 = vpop.f32.mrb[18].mxu0  ;;  %v2177_v54 = vpop.f32.mrb[18].mxu1  ;;  %v822_v58 = vsel %vm737_vm1, %v685_v46, 0.0  ;;  %v800_v9 = vadd.f32 %v799_v48, %v798_v38  ;;  %v811_v61 = vrot.slane %v810_v51, 2  ;;  %v430_v12 = vadd.f32 %v1668_v63, %v2092_v4 }
 0x100   :  { %v2180_v59 = vpop.f32.mrb[19].mxu0  ;;  %v2182_v60 = vpop.f32.mrb[19].mxu1  ;;  %v832_v1 = vrot.slane %v831_v52, 2  ;;  %v823_v2 = vrot.slane %v822_v58, 4  ;;  %v1195_v7 = vmul.f32 0.125, %v807_v56  ;;  %v820_v8 = vrot.slane %v819_v57, 1 }
 0x101   :  { %v1194_v13 = vmul.f32 0.125, %v800_v9  ;;  %v812_v15 = vadd.f32 %v811_v61, %v810_v51  ;;  %v789_v24 = vadd.f32 %v788_v55, %v787_v23  ;;  %v708_v25 = vmax.f32 %v2156_v16, 0.0 }
 0x102   :  { %v833_v17 = vadd.f32 %v832_v1, %v831_v52  ;;  %v824_v19 = vadd.f32 %v823_v2, %v822_v58  ;;  %v688_v26 = vmax.f32 %v430_v12, 0.0  ;;  %v425_v31 = vadd.f32 %v2092_v4, %v424_v10 }
 0x103   :  { %v2185_v20 = vpop.f32.mrb[20].mxu0  ;;  %v2187_v22 = vpop.f32.mrb[20].mxu1  ;;  %v1339_v63 = vsel %vm1325_vm2, %v1195_v7, %v1194_v13  ;;  %v813_v6 = vrot.slane %v812_v15, 1  ;;  %v707_v38 = vmax.f32 %v525_v43, 0.0  ;;  %v821_v39 = vadd.f32 %v820_v8, %v819_v57 }
 0x104   :  { %v2191_v33 = vpop.f32.mrb[21].mxu0  ;;  %v2193_v34 = vpop.f32.mrb[21].mxu1  ;;  %v825_v37 = vrot.slane %v824_v19, 2  ;;  %v834_v40 = vrot.slane %v833_v17, 1  ;;  %v843_v41 = vsel %vm737_vm1, %v688_v26, 0.0  ;;  %v687_v45 = vmax.f32 %v425_v31, 0.0 }
 0x105   :  { %v814_v23 = vadd.f32 %v813_v6, %v812_v15  ;;  %v844_v16 = vrot.slane %v843_v41, 4  ;;  %v540_v10 = vadd.f32 %v2100_v14, %v2092_v4  ;;  %v790_v52 = vrot.slane %v789_v24, 2 }
 0x106   :  { %v826_v46 = vadd.f32 %v825_v37, %v824_v19  ;;  %v836_v55 = vsel %vm737_vm1, %v687_v45, 0.0  ;;  %v440_v43 = vadd.f32 %v2160_v29, %v2092_v4  ;;  %v983_v61 = vsel %vm737_vm1, %v708_v25, 0.0 }
 0x107   :  { %v2199_v48 = vpop.f32.mrb[22].mxu0  ;;  %v2201_v51 = vpop.f32.mrb[22].mxu1  ;;  %v1196_v58 = vmul.f32 0.125, %v814_v23  ;;  %v976_v14 = vsel %vm737_vm1, %v707_v38, 0.0  ;;  %v1197_v1 = vmul.f32 0.125, %v821_v39  ;;  %v835_v2 = vadd.f32 %v834_v40, %v833_v17 }
 0x108   :  { %v2206_v56 = vpop.f32.mrb[23].mxu0  ;;  %v2208_v57 = vpop.f32.mrb[23].mxu1  ;;  %v827_v9 = vrot.slane %v826_v46, 1  ;;  %v837_v7 = vrot.slane %v836_v55, 4  ;;  %v690_v8 = vmax.f32 %v440_v43, 0.0  ;;  %v845_v15 = vadd.f32 %v844_v16, %v843_v41 }
 0x109   :  { %v1340_v12 = vsel %vm1327_vm3, %v1196_v58, %v1339_v63  ;;  %v710_v19 = vmax.f32 %v540_v10, 0.0  ;;  %v791_v31 = vadd.f32 %v790_v52, %v789_v24  ;;  %v984_v37 = vrot.slane %v983_v61, 4 }
 0x10a   :  { %v828_v13 = vadd.f32 %v827_v9, %v826_v46  ;;  %v1341_v6 = vsel %vm1329_vm4, %v1197_v1, %v1340_v12  ;;  %v838_v25 = vadd.f32 %v837_v7, %v836_v55  ;;  %v977_v39 = vrot.slane %v976_v14, 4 }
 0x10b   :  { %v2213_v29 = vpop.f32.mrb[24].mxu0  ;;  %v2215_v26 = vpop.f32.mrb[24].mxu1  ;;  %v857_v63 = vsel %vm737_vm1, %v690_v8, 0.0  ;;  %v535_v40 = vadd.f32 %v2092_v4, %v2104_v18  ;;  %v1199_v41 = vmul.f32 0.125, %v835_v2  ;;  %v435_v24 = vadd.f32 %v2092_v4, %v2166_v35 }
 0x10c   :  { %v2218_v45 = vpop.f32.mrb[25].mxu0  ;;  %v2220_v38 = vpop.f32.mrb[25].mxu1  ;;  %v1198_v17 = vmul.f32 0.125, %v828_v13  ;;  %v839_v23 = vrot.slane %v838_v25, 2  ;;  %v858_v46 = vrot.slane %v857_v63, 4  ;;  %v846_v10 = vrot.slane %v845_v15, 2 }
 0x10d   :  { %v997_v52 = vsel %vm737_vm1, %v710_v19, 0.0  ;;  %v792_v58 = vrot.slane %v791_v31, 1  ;;  %v985_v8 = vadd.f32 %v984_v37, %v983_v61  ;;  %v978_v35 = vadd.f32 %v977_v39, %v976_v14 }
 0x10e   :  { %v1342_v16 = vsel %vm1331_vm5, %v1198_v17, %v1341_v6  ;;  %v840_v9 = vadd.f32 %v839_v23, %v838_v25  ;;  %v859_v18 = vadd.f32 %v858_v46, %v857_v63  ;;  %v709_v12 = vmax.f32 %v535_v40, 0.0 }
 0x10f   :  { %v2229_v55 = vpop.f32.mrb[26].mxu0  ;;  %v2231_v43 = vpop.f32.mrb[26].mxu1  ;;  %v1343_v1 = vsel %vm1333_vm6, %v1199_v41, %v1342_v16  ;;  %v689_v13 = vmax.f32 %v435_v24, 0.0  ;;  %v450_v19 = vadd.f32 %v2175_v53, %v2092_v4  ;;  %v847_v3 = vadd.f32 %v846_v10, %v845_v15 }
 0x110   :  { %2551 = vst [vmem:[#allocation3_spill] sm:$0xff] %v2231_v43  ;;  %v2234_v2 = vpop.f32.mrb[27].mxu0  ;;  %v2236_v7 = vpop.f32.mrb[27].mxu1  ;;  %v841_v6 = vrot.slane %v840_v9, 1  ;;  %v860_v17 = vrot.slane %v859_v18, 2  ;;  %v998_v43 = vrot.slane %v997_v52, 4  ;;  %v793_v41 = vadd.f32 %v792_v58, %v791_v31 }
 0x111   :  { %2552 = vst [vmem:[#allocation4_spill] sm:$0xff] %v2236_v7  ;;  %v850_v25 = vsel %vm737_vm1, %v689_v13, 0.0  ;;  %v986_v39 = vrot.slane %v985_v8, 2  ;;  %v979_v40 = vrot.slane %v978_v35, 2  ;;  %v990_v53 = vsel %vm737_vm1, %v709_v12, 0.0 }
 0x112   :  { %v842_v46 = vadd.f32 %v841_v6, %v840_v9  ;;  %v861_v16 = vadd.f32 %v860_v17, %v859_v18  ;;  %v851_v61 = vrot.slane %v850_v25, 4  ;;  %v692_v15 = vmax.f32 %v450_v19, 0.0 }
 0x113   :  { %v2241_v23 = vpop.f32.mrb[28].mxu0  ;;  %v2243_v63 = vpop.f32.mrb[28].mxu1  ;;  %v445_v7 = vadd.f32 %v2092_v4, %v2180_v59  ;;  %v2252_v31 = vadd.f32 %v998_v43, %v997_v52  ;;  %v2257_v18 = vmul.f32 0.125, %v793_v41  ;;  %v550_v59 = vadd.f32 %v2108_v27, %v2092_v4 }
 0x114   :  { %2553 = vst [vmem:[#allocation5_spill] sm:$0xff] %v2243_v63  ;;  %v2245_v14 = vpop.f32.mrb[29].mxu0  ;;  %v2247_v37 = vpop.f32.mrb[29].mxu1  ;;  %v1200_v24 = vmul.f32 0.125, %v842_v46  ;;  %v862_v10 = vrot.slane %v861_v16, 1  ;;  %v852_v13 = vadd.f32 %v851_v61, %v850_v25  ;;  %v848_v63 = vrot.slane %v847_v3, 1 }
 0x115   :  { %2554 = vst [vmem:[#allocation6_spill] sm:$0xff] %v2247_v37  ;;  %v871_v58 = vsel %vm737_vm1, %v692_v15, 0.0  ;;  %v2264_v25 = vadd.f32 %v986_v39, %v985_v8  ;;  %v991_v46 = vrot.slane %v990_v53, 4  ;;  %v691_v52 = vmax.f32 %v445_v7, 0.0 }
 0x116   :  { %v2260_v6 = vsel %vm1335_vm7, %v1200_v24, %v1343_v1  ;;  %v853_v12 = vrot.slane %v852_v13, 2  ;;  %v872_v17 = vrot.slane %v871_v58, 4  ;;  %v2268_v43 = vadd.f32 %v979_v40, %v978_v35 }
 0x117   :  { %v2255_v9 = vpop.f32.mrb[30].mxu0  ;;  %2556 = vst [vmem:[#allocation8_spill] sm:$0xff] %v2264_v25  ;;  %v863_v61 = vadd.f32 %v862_v10, %v861_v16  ;;  %v849_v37 = vadd.f32 %v848_v63, %v847_v3  ;;  %v864_v24 = vsel %vm737_vm1, %v691_v52, 0.0  ;;  %v545_v27 = vadd.f32 %v2092_v4, %v2112_v32 }
 0x118   :  { %v2262_v19 = vpop.f32.mrb[31].mxu0  ;;  %2557 = vst [vmem:[#allocation9_spill] sm:$0xff] %v2268_v43  ;;  %v854_v15 = vadd.f32 %v853_v12, %v852_v13  ;;  %v873_v41 = vadd.f32 %v872_v17, %v871_v58  ;;  %v865_v7 = vrot.slane %v864_v24, 4  ;;  %v2280_v16 = vadd.f32 %v991_v46, %v990_v53 }
 0x119   :  { %2555 = vst [vmem:[#allocation7_spill] sm:$0xff] %v2262_v19  ;;  %v560_v19 = vadd.f32 %v2116_v44, %v2092_v4  ;;  %v712_v3 = vmax.f32 %v550_v59, 0.0  ;;  %v555_v40 = vadd.f32 %v2092_v4, %v2119_v49  ;;  %v1203_v10 = vmul.f32 0.125, %v863_v61 }
 0x11a   :  { %v855_v39 = vrot.slane %v854_v15, 1  ;;  %v874_v25 = vrot.slane %v873_v41, 2  ;;  %v866_v58 = vadd.f32 %v865_v7, %v864_v24  ;;  %v2284_v12 = vmul.f32 0.125, %v849_v37 }
 0x11b   :  { %v2274_v8 = vpop.f32.mrb[32].mxu0  ;;  %v714_v63 = vmax.f32 %v560_v19, 0.0  ;;  %v713_v52 = vmax.f32 %v555_v40, 0.0  ;;  %v460_v32 = vadd.f32 %v2185_v20, %v2092_v4  ;;  %v711_v46 = vmax.f32 %v545_v27, 0.0 }
 0x11c   :  { %v2278_v35 = vpop.f32.mrb[33].mxu0  ;;  %v856_v13 = vadd.f32 %v855_v39, %v854_v15  ;;  %v875_v44 = vadd.f32 %v874_v25, %v873_v41  ;;  %v867_v59 = vrot.slane %v866_v58, 2  ;;  %v2290_v19 = vsel %vm737_vm1, %v712_v3, 0.0 }
 0x11d   :  { %v1025_v17 = vsel %vm737_vm1, %v714_v63, 0.0  ;;  %v1018_v61 = vsel %vm737_vm1, %v713_v52, 0.0  ;;  %v694_v25 = vmax.f32 %v460_v32, 0.0  ;;  %v570_v27 = vadd.f32 %v2123_v62, %v2092_v4 }
 0x11e   :  { %v1202_v1 = vmul.f32 0.125, %v856_v13  ;;  %v876_v53 = vrot.slane %v875_v44, 1  ;;  %v1026_v49 = vrot.slane %v1025_v17, 4  ;;  %v868_v24 = vadd.f32 %v867_v59, %v866_v58 }
 0x11f   :  { %v1019_v7 = vrot.slane %v1018_v61, 4  ;;  %v885_v20 = vsel %vm737_vm1, %v694_v25, 0.0  ;;  %v2300_v63 = vsel %vm737_vm1, %v711_v46, 0.0  ;;  %v716_v37 = vmax.f32 %v570_v27, 0.0 }
 0x120   :  { %v1346_v15 = vsel %vm1325_vm2, %v1203_v10, %v1202_v1  ;;  %v877_v41 = vadd.f32 %v876_v53, %v875_v44  ;;  %v1027_v39 = vadd.f32 %v1026_v49, %v1025_v17  ;;  %v869_v40 = vrot.slane %v868_v24, 1 }
 0x121   :  { %v886_v13 = vrot.slane %v885_v20, 4  ;;  %v1020_v32 = vadd.f32 %v1019_v7, %v1018_v61  ;;  %v455_v1 = vadd.f32 %v2092_v4, %v2191_v33  ;;  %v565_v17 = vadd.f32 %v2092_v4, %v2125_v5 }
 0x122   :  { %v1028_v52 = vrot.slane %v1027_v39, 2  ;;  %v1205_v10 = vmul.f32 0.125, %v877_v41  ;;  %v870_v44 = vadd.f32 %v869_v40, %v868_v24  ;;  %v1039_v59 = vsel %vm737_vm1, %v716_v37, 0.0 }
 0x123   :  { %v887_v58 = vadd.f32 %v886_v13, %v885_v20  ;;  %v1021_v53 = vrot.slane %v1020_v32, 2  ;;  %v693_v46 = vmax.f32 %v455_v1, 0.0  ;;  %v1040_v3 = vrot.slane %v1039_v59, 4 }
 0x124   :  { %v1029_v62 = vadd.f32 %v1028_v52, %v1027_v39  ;;  %v1204_v49 = vmul.f32 0.125, %v870_v44  ;;  %v715_v43 = vmax.f32 %v565_v17, 0.0  ;;  %v580_v33 = vadd.f32 %v2128_v21, %v2092_v4 }
 0x125   :  { %v888_v25 = vrot.slane %v887_v58, 2  ;;  %v1022_v7 = vadd.f32 %v1021_v53, %v1020_v32  ;;  %v878_v27 = vsel %vm737_vm1, %v693_v46, 0.0  ;;  %v1041_v5 = vadd.f32 %v1040_v3, %v1039_v59 }
 0x126   :  { %v1030_v61 = vrot.slane %v1029_v62, 1  ;;  %v1347_v41 = vsel %vm1327_vm3, %v1204_v49, %v1346_v15  ;;  %v879_v39 = vrot.slane %v878_v27, 4  ;;  %v1032_v13 = vsel %vm737_vm1, %v715_v43, 0.0 }
 0x127   :  { %v889_v24 = vadd.f32 %v888_v25, %v887_v58  ;;  %v1023_v40 = vrot.slane %v1022_v7, 1  ;;  %v1348_v37 = vsel %vm1329_vm4, %v1205_v10, %v1347_v41  ;;  %v1042_v1 = vrot.slane %v1041_v5, 2 }
 0x128   :  { %v1031_v20 = vadd.f32 %v1030_v61, %v1029_v62  ;;  %v880_v44 = vadd.f32 %v879_v39, %v878_v27  ;;  %v1033_v32 = vrot.slane %v1032_v13, 4  ;;  %v718_v46 = vmax.f32 %v580_v33, 0.0 }
 0x129   :  { %v890_v52 = vrot.slane %v889_v24, 1  ;;  %v1024_v53 = vadd.f32 %v1023_v40, %v1022_v7  ;;  %v575_v21 = vadd.f32 %v2092_v4, %v2132_v28  ;;  %v1043_v58 = vadd.f32 %v1042_v1, %v1041_v5 }
 0x12a   :  { %v1227_v17 = vmul.f32 0.125, %v1031_v20  ;;  %v881_v3 = vrot.slane %v880_v44, 2  ;;  %v1034_v59 = vadd.f32 %v1033_v32, %v1032_v13  ;;  %v1053_v49 = vsel %vm737_vm1, %v718_v46, 0.0 }
 0x12b   :  { %v891_v15 = vadd.f32 %v890_v52, %v889_v24  ;;  %v1226_v62 = vmul.f32 0.125, %v1024_v53  ;;  %v717_v10 = vmax.f32 %v575_v21, 0.0  ;;  %v470_v43 = vadd.f32 %v2199_v48, %v2092_v4 }
 0x12c   :  { %v1044_v61 = vrot.slane %v1043_v58, 1  ;;  %v882_v27 = vadd.f32 %v881_v3, %v880_v44  ;;  %v1035_v41 = vrot.slane %v1034_v59, 2  ;;  %v1054_v33 = vrot.slane %v1053_v49, 4 }
 0x12d   :  { %v1207_v25 = vmul.f32 0.125, %v891_v15  ;;  %v1367_v7 = vsel %vm1325_vm2, %v1227_v17, %v1226_v62  ;;  %v1046_v28 = vsel %vm737_vm1, %v717_v10, 0.0  ;;  %v696_v24 = vmax.f32 %v470_v43, 0.0 }
 0x12e   :  { %v1045_v5 = vadd.f32 %v1044_v61, %v1043_v58  ;;  %v883_v39 = vrot.slane %v882_v27, 1  ;;  %v1036_v20 = vadd.f32 %v1035_v41, %v1034_v59  ;;  %v1047_v40 = vrot.slane %v1046_v28, 4 }
 0x12f   :  { %v1055_v13 = vadd.f32 %v1054_v33, %v1053_v49  ;;  %v899_v52 = vsel %vm737_vm1, %v696_v24, 0.0  ;;  %v590_v48 = vadd.f32 %v2137_v42, %v2092_v4  ;;  %v465_v1 = vadd.f32 %v2092_v4, %v2206_v56 }
 0x130   :  { %v1229_v44 = vmul.f32 0.125, %v1045_v5  ;;  %v884_v32 = vadd.f32 %v883_v39, %v882_v27  ;;  %v1037_v17 = vrot.slane %v1036_v20, 1  ;;  %v1048_v53 = vadd.f32 %v1047_v40, %v1046_v28 }
 0x131   :  { %v1056_v46 = vrot.slane %v1055_v13, 2  ;;  %v900_v21 = vrot.slane %v899_v52, 4  ;;  %v720_v15 = vmax.f32 %v590_v48, 0.0  ;;  %v695_v58 = vmax.f32 %v465_v1, 0.0 }
 0x132   :  { %v1206_v3 = vmul.f32 0.125, %v884_v32  ;;  %v1038_v59 = vadd.f32 %v1037_v17, %v1036_v20  ;;  %v1049_v62 = vrot.slane %v1048_v53, 2  ;;  %v585_v49 = vadd.f32 %v2092_v4, %v2141_v50 }
 0x133   :  { %v1057_v10 = vadd.f32 %v1056_v46, %v1055_v13  ;;  %v901_v43 = vadd.f32 %v900_v21, %v899_v52  ;;  %v1067_v42 = vsel %vm737_vm1, %v720_v15, 0.0  ;;  %v892_v56 = vsel %vm737_vm1, %v695_v58, 0.0 }
 0x134   :  { %v1349_v61 = vsel %vm1331_vm5, %v1206_v3, %v1348_v37  ;;  %v1228_v27 = vmul.f32 0.125, %v1038_v59  ;;  %v1050_v41 = vadd.f32 %v1049_v62, %v1048_v53  ;;  %v1068_v33 = vrot.slane %v1067_v42, 4 }
 0x135   :  { %v1058_v28 = vrot.slane %v1057_v10, 1  ;;  %v902_v24 = vrot.slane %v901_v43, 2  ;;  %v893_v5 = vrot.slane %v892_v56, 4  ;;  %v1350_v39 = vsel %vm1333_vm6, %v1207_v25, %v1349_v61 }
 0x136   :  { %v1368_v20 = vsel %vm1327_vm3, %v1228_v27, %v1367_v7  ;;  %v1051_v40 = vrot.slane %v1050_v41, 1  ;;  %v1069_v50 = vadd.f32 %v1068_v33, %v1067_v42  ;;  %v719_v13 = vmax.f32 %v585_v49, 0.0 }
 0x137   :  { %v1059_v52 = vadd.f32 %v1058_v28, %v1057_v10  ;;  %v1369_v48 = vsel %vm1329_vm4, %v1229_v44, %v1368_v20  ;;  %v903_v1 = vadd.f32 %v902_v24, %v901_v43  ;;  %v894_v32 = vadd.f32 %v893_v5, %v892_v56 }
 0x138   :  { %v1052_v17 = vadd.f32 %v1051_v40, %v1050_v41  ;;  %v1070_v37 = vrot.slane %v1069_v50, 2  ;;  %v1060_v53 = vsel %vm737_vm1, %v719_v13, 0.0  ;;  %v600_v46 = vadd.f32 %v2146_v0, %v2092_v4 }
 0x139   :  { %v1231_v21 = vmul.f32 0.125, %v1059_v52  ;;  %v904_v15 = vrot.slane %v903_v1, 1  ;;  %v895_v25 = vrot.slane %v894_v32, 2  ;;  %v1061_v58 = vrot.slane %v1060_v53, 4 }
 0x13a   :  { %v1230_v7 = vmul.f32 0.125, %v1052_v17  ;;  %v2336_v3 = vadd.f32 %v1070_v37, %v1069_v50  ;;  %v722_v59 = vmax.f32 %v600_v46, 0.0  ;;  %v595_v44 = vadd.f32 %v2092_v4, %v2151_v11 }
 0x13b   :  { %v2558_v62 = vrot.slane %v2290_v19, 4  ;;  %v896_v10 = vadd.f32 %v895_v25, %v894_v32  ;;  %v1062_v43 = vadd.f32 %v1061_v58, %v1060_v53  ;;  %v480_v0 = vadd.f32 %v2213_v29, %v2092_v4 }
 0x13c   :  { %v1370_v42 = vsel %vm1331_vm5, %v1230_v7, %v1369_v48  ;;  %v905_v56 = vadd.f32 %v904_v15, %v903_v1  ;;  %v1081_v61 = vsel %vm737_vm1, %v722_v59, 0.0  ;;  %v721_v27 = vmax.f32 %v595_v44, 0.0 }
 0x13d   :  { %v2343_v49 = vadd.f32 %v2558_v62, %v2290_v19  ;;  %v1005_v41 = vrot.slane %v2300_v63, 4  ;;  %v897_v33 = vrot.slane %v896_v10, 1  ;;  %v1063_v11 = vrot.slane %v1062_v43, 2 }
 0x13e   :  { %v1371_v28 = vsel %vm1333_vm6, %v1231_v21, %v1370_v42  ;;  %v1072_v19 = vrot.slane %v2336_v3, 1  ;;  %v1082_v24 = vrot.slane %v1081_v61, 4  ;;  %v1074_v5 = vsel %vm737_vm1, %v721_v27, 0.0 }
 0x13f   :  { %v698_v20 = vmax.f32 %v480_v0, 0.0  ;;  %v898_v40 = vadd.f32 %v897_v33, %v896_v10  ;;  %v1064_v29 = vadd.f32 %v1063_v11, %v1062_v43  ;;  %v1075_v50 = vrot.slane %v1074_v5, 4 }
 0x140   :  { %v610_v13 = vadd.f32 %v2162_v30, %v2092_v4  ;;  %v2355_v52 = vmul.f32 0.125, %v905_v56  ;;  %v1083_v48 = vadd.f32 %v1082_v24, %v1081_v61  ;;  %v475_v32 = vadd.f32 %v2092_v4, %v2218_v45 }
 0x141   :  { %v913_v1 = vsel %vm737_vm1, %v698_v20, 0.0  ;;  %v1208_v17 = vmul.f32 0.125, %v898_v40  ;;  %v1065_v37 = vrot.slane %v1064_v29, 1  ;;  %v1076_v53 = vadd.f32 %v1075_v50, %v1074_v5 }
 0x142   :  { %v914_v46 = vrot.slane %v913_v1, 4  ;;  %v1084_v21 = vrot.slane %v1083_v48, 2  ;;  %v724_v15 = vmax.f32 %v610_v13, 0.0  ;;  %v697_v25 = vmax.f32 %v475_v32, 0.0 }
 0x143   :  { %v605_v58 = vadd.f32 %v2092_v4, %v2168_v36  ;;  %v2363_v30 = vsel %vm1335_vm7, %v1208_v17, %v1350_v39  ;;  %v1066_v7 = vadd.f32 %v1065_v37, %v1064_v29  ;;  %v1077_v59 = vrot.slane %v1076_v53, 2 }
 0x144   :  { %v915_v44 = vadd.f32 %v914_v46, %v913_v1  ;;  %v1085_v62 = vadd.f32 %v1084_v21, %v1083_v48  ;;  %v1095_v10 = vsel %vm737_vm1, %v724_v15, 0.0  ;;  %v906_v45 = vsel %vm737_vm1, %v697_v25, 0.0 }
 0x145   :  { %v723_v43 = vmax.f32 %v605_v58, 0.0  ;;  %v1232_v0 = vmul.f32 0.125, %v1066_v7  ;;  %v1078_v42 = vadd.f32 %v1077_v59, %v1076_v53  ;;  %v1096_v61 = vrot.slane %v1095_v10, 4 }
 0x146   :  { %v916_v56 = vrot.slane %v915_v44, 2  ;;  %v1086_v27 = vrot.slane %v1085_v62, 1  ;;  %v907_v33 = vrot.slane %v906_v45, 4  ;;  %v620_v39 = vadd.f32 %v2177_v54, %v2092_v4 }
 0x147   :  { %v1088_v36 = vsel %vm737_vm1, %v723_v43, 0.0  ;;  %v2371_v11 = vsel %vm1335_vm7, %v1232_v0, %v1371_v28  ;;  %v1079_v24 = vrot.slane %v1078_v42, 1  ;;  %v1097_v20 = vadd.f32 %v1096_v61, %v1095_v10 }
 0x148   :  { %v917_v5 = vadd.f32 %v916_v56, %v915_v44  ;;  %v1087_v40 = vadd.f32 %v1086_v27, %v1085_v62  ;;  %v908_v29 = vadd.f32 %v907_v33, %v906_v45  ;;  %v1089_v50 = vrot.slane %v1088_v36, 4 }
 0x149   :  { %v726_v13 = vmax.f32 %v620_v39, 0.0  ;;  %v1080_v48 = vadd.f32 %v1079_v24, %v1078_v42  ;;  %v1098_v32 = vrot.slane %v1097_v20, 2  ;;  %v615_v17 = vadd.f32 %v2092_v4, %v2182_v60 }
 0x14a   :  { %v918_v1 = vrot.slane %v917_v5, 1  ;;  %v1235_v37 = vmul.f32 0.125, %v1087_v40  ;;  %v909_v53 = vrot.slane %v908_v29, 2  ;;  %v1090_v46 = vadd.f32 %v1089_v50, %v1088_v36  ;;  %v2383_v36 = vld [vmem:[%s2543_s2] ss:$0 sm:$0xff] }
 0x14b   :  { %v1109_v54 = vsel %vm737_vm1, %v726_v13, 0.0  ;;  %v1234_v28 = vmul.f32 0.125, %v1080_v48  ;;  %v1099_v15 = vadd.f32 %v1098_v32, %v1097_v20  ;;  %v725_v59 = vmax.f32 %v615_v17, 0.0 }
 0x14c   :  { %v919_v21 = vadd.f32 %v918_v1, %v917_v5  ;;  %v1110_v25 = vrot.slane %v1109_v54, 4  ;;  %v910_v58 = vadd.f32 %v909_v53, %v908_v29  ;;  %v1091_v7 = vrot.slane %v1090_v46, 2 }
 0x14d   :  { %v490_v44 = vadd.f32 %v2229_v55, %v2092_v4  ;;  %v1374_v62 = vsel %vm1325_vm2, %v1235_v37, %v1234_v28  ;;  %v1100_v60 = vrot.slane %v1099_v15, 1  ;;  %v1102_v42 = vsel %vm737_vm1, %v725_v59, 0.0 }
 0x14e   :  { %v1211_v10 = vmul.f32 0.125, %v919_v21  ;;  %v1111_v45 = vadd.f32 %v1110_v25, %v1109_v54  ;;  %v911_v43 = vrot.slane %v910_v58, 1  ;;  %v1092_v0 = vadd.f32 %v1091_v7, %v1090_v46 }
 0x14f   :  { %v700_v56 = vmax.f32 %v490_v44, 0.0  ;;  %v1101_v61 = vadd.f32 %v1100_v60, %v1099_v15  ;;  %v1103_v33 = vrot.slane %v1102_v42, 4  ;;  %v630_v4 = vadd.f32 %v2383_v36, %v2187_v22 }
 0x150   :  { %v1112_v27 = vrot.slane %v1111_v45, 2  ;;  %v912_v55 = vadd.f32 %v911_v43, %v910_v58  ;;  %v1093_v39 = vrot.slane %v1092_v0, 1  ;;  %v485_v5 = vadd.f32 %v2383_v36, %v2234_v2 }
 0x151   :  { %v927_v24 = vsel %vm737_vm1, %v700_v56, 0.0  ;;  %v1237_v20 = vmul.f32 0.125, %v1101_v61  ;;  %v1104_v29 = vadd.f32 %v1103_v33, %v1102_v42  ;;  %v728_v1 = vmax.f32 %v630_v4, 0.0 }
 0x152   :  { %v1113_v40 = vadd.f32 %v1112_v27, %v1111_v45  ;;  %v928_v50 = vrot.slane %v927_v24, 4  ;;  %v1210_v13 = vmul.f32 0.125, %v912_v55  ;;  %v1094_v48 = vadd.f32 %v1093_v39, %v1092_v0 }
 0x153   :  { %v699_v32 = vmax.f32 %v485_v5, 0.0  ;;  %v1105_v37 = vrot.slane %v1104_v29, 2  ;;  %v625_v22 = vadd.f32 %v2383_v36, %v2193_v34  ;;  %v1123_v2 = vsel %vm737_vm1, %v728_v1, 0.0 }
 0x154   :  { %v1114_v17 = vrot.slane %v1113_v40, 1  ;;  %v929_v53 = vadd.f32 %v928_v50, %v927_v24  ;;  %v2393_v46 = vsel %vm1325_vm2, %v1211_v10, %v1210_v13  ;;  %v1236_v54 = vmul.f32 0.125, %v1094_v48 }
 0x155   :  { %v920_v28 = vsel %vm737_vm1, %v699_v32, 0.0  ;;  %v1106_v15 = vadd.f32 %v1105_v37, %v1104_v29  ;;  %v1124_v58 = vrot.slane %v1123_v2, 4  ;;  %v727_v44 = vmax.f32 %v625_v22, 0.0 }
 0x156   :  { %v1115_v21 = vadd.f32 %v1114_v17, %v1113_v40  ;;  %v930_v25 = vrot.slane %v929_v53, 2  ;;  %v1375_v7 = vsel %vm1327_vm3, %v1236_v54, %v1374_v62  ;;  %v921_v59 = vrot.slane %v920_v28, 4 }
 0x157   :  { %v1338_v34 = vsel %vm1337_vm8, %v2257_v18, %v2173_v47  ;;  %v1107_v10 = vrot.slane %v1106_v15, 1  ;;  %v1376_v45 = vsel %vm1329_vm4, %v1237_v20, %v1375_v7  ;;  %v1125_v0 = vadd.f32 %v1124_v58, %v1123_v2 }
 0x158   :  { %v1239_v60 = vmul.f32 0.125, %v1115_v21  ;;  %v931_v43 = vadd.f32 %v930_v25, %v929_v53  ;;  %v922_v42 = vadd.f32 %v921_v59, %v920_v28  ;;  %v1116_v56 = vsel %vm737_vm1, %v727_v44, 0.0 }
 0x159   :  { %v1345_v61 = vsel %vm1337_vm8, %v2284_v12, %v2260_v6  ;;  %v1108_v47 = vadd.f32 %v1107_v10, %v1106_v15  ;;  %v1117_v27 = vrot.slane %v1116_v56, 4  ;;  %v1126_v4 = vrot.slane %v1125_v0, 2 }
 0x15a   :  { %v932_v18 = vrot.slane %v931_v43, 1  ;;  %v1765_v33 = vpack.c.bf16 %v1345_v61, %v1338_v34  ;;  %v923_v55 = vrot.slane %v922_v42, 2  ;;  %v640_v39 = vadd.f32 %v2383_v36, %v2201_v51 }
 0x15b   :  { %v635_v24 = vadd.f32 %v2383_v36, %v2208_v57  ;;  %v1238_v5 = vmul.f32 0.125, %v1108_v47  ;;  %v1118_v12 = vadd.f32 %v1117_v27, %v1116_v56  ;;  %v500_v20 = vadd.f32 %v2383_v36, %v2241_v23 }
 0x15c   :  { %v933_v6 = vadd.f32 %v932_v18, %v931_v43  ;;  %1767 = vmatpush3.bf16.xpose.msk.msra.mxu1 %vm2408_vm9, %v1765_v33  ;;  %v1127_v40 = vadd.f32 %v1126_v4, %v1125_v0  ;;  %v924_v29 = vadd.f32 %v923_v55, %v922_v42  ;;  %v730_v50 = vmax.f32 %v640_v39, 0.0 }
 0x15d   :  { %v729_v13 = vmax.f32 %v635_v24, 0.0  ;;  %v2561_v48 = vmov 0.0|0.0   ;;  %v2424_v51 = vadd.f32 %v1072_v19, %v2336_v3  ;;  %v1377_v57 = vsel %vm1331_vm5, %v1238_v5, %v1376_v45 }
 0x15e   :  { %1768 = vmatprep.subr.bf16.mxu1 %v2561_v48  ;;  %v1119_v1 = vrot.slane %v1118_v12, 2  ;;  %v702_v32 = vmax.f32 %v500_v20, 0.0  ;;  %v1128_v17 = vrot.slane %v1127_v40, 1  ;;  %v925_v37 = vrot.slane %v924_v29, 1 }
 0x15f   :  { %v1378_v53 = vsel %vm1333_vm6, %v1239_v60, %v1377_v57  ;;  %v1137_v23 = vsel %vm737_vm1, %v730_v50, 0.0  ;;  %v1130_v2 = vsel %vm737_vm1, %v729_v13, 0.0  ;;  %v1213_v21 = vmul.f32 0.125, %v933_v6  ;;  %v2562_v57 = vld [vmem:[#allocation3_spill] sm:$0xff] }
 0x160   :  { %v1120_v22 = vadd.f32 %v1119_v1, %v1118_v12  ;;  %v1138_v54 = vrot.slane %v1137_v23, 4  ;;  %v941_v28 = vsel %vm737_vm1, %v702_v32, 0.0  ;;  %v926_v15 = vadd.f32 %v925_v37, %v924_v29  ;;  %v2563_v32 = vld [vmem:[#allocation4_spill] sm:$0xff] }
 0x161   :  { %v1131_v3 = vrot.slane %v1130_v2, 4  ;;  %v942_v19 = vrot.slane %v941_v28, 4  ;;  %v650_v7 = vadd.f32 %v2383_v36, %v2215_v26  ;;  %v495_v59 = vadd.f32 %v2383_v36, %v2245_v14 }
 0x162   :  { %v1121_v25 = vrot.slane %v1120_v22, 1  ;;  %v1139_v58 = vadd.f32 %v1138_v54, %v1137_v23  ;;  %v2435_v44 = vadd.f32 %v1128_v17, %v1127_v40  ;;  %v1212_v34 = vmul.f32 0.125, %v926_v15 }
 0x163   :  { %v1132_v60 = vadd.f32 %v1131_v3, %v1130_v2  ;;  %v943_v10 = vadd.f32 %v942_v19, %v941_v28  ;;  %v732_v0 = vmax.f32 %v650_v7, 0.0  ;;  %v701_v42 = vmax.f32 %v495_v59, 0.0 }
 0x164   :  { %v1122_v45 = vadd.f32 %v1121_v25, %v1120_v22  ;;  %v1140_v43 = vrot.slane %v1139_v58, 2  ;;  %v1354_v56 = vsel %vm1327_vm3, %v1212_v34, %v2393_v46  ;;  %v645_v26 = vadd.f32 %v2383_v36, %v2220_v38 }
 0x165   :  { %v1133_v61 = vrot.slane %v1132_v60, 2  ;;  %v944_v47 = vrot.slane %v943_v10, 2  ;;  %v1151_v14 = vsel %vm737_vm1, %v732_v0, 0.0  ;;  %v934_v33 = vsel %vm737_vm1, %v701_v42, 0.0 }
 0x166   :  { %v1240_v18 = vmul.f32 0.125, %v1122_v45  ;;  %v1141_v27 = vadd.f32 %v1140_v43, %v1139_v58  ;;  %v1152_v39 = vrot.slane %v1151_v14, 4  ;;  %v935_v24 = vrot.slane %v934_v33, 4 }
 0x167   :  { %v1134_v4 = vadd.f32 %v1133_v61, %v1132_v60  ;;  %v945_v55 = vadd.f32 %v944_v47, %v943_v10  ;;  %v1355_v46 = vsel %vm1329_vm4, %v1213_v21, %v1354_v56  ;;  %v731_v12 = vmax.f32 %v645_v26, 0.0  ;;  %v2564_v61 = vld [vmem:[#allocation5_spill] sm:$0xff] }
 0x168   :  { %v2444_v5 = vsel %vm1335_vm7, %v1240_v18, %v1378_v53  ;;  %v1142_v6 = vrot.slane %v1141_v27, 1  ;;  %v1153_v38 = vadd.f32 %v1152_v39, %v1151_v14  ;;  %v936_v29 = vadd.f32 %v935_v24, %v934_v33  ;;  %v2565_v14 = vld [vmem:[#allocation7_spill] sm:$0xff] }
 0x169   :  { %v1135_v20 = vrot.slane %v1134_v4, 1  ;;  %v946_v40 = vrot.slane %v945_v55, 1  ;;  %v1144_v13 = vsel %vm737_vm1, %v731_v12, 0.0  ;;  %v660_v1 = vadd.f32 %v2383_v36, %v2562_v57 }
 0x16a   :  { %v1143_v50 = vadd.f32 %v1142_v6, %v1141_v27  ;;  %v655_v17 = vadd.f32 %v2383_v36, %v2563_v32  ;;  %v1154_v23 = vrot.slane %v1153_v38, 2  ;;  %v937_v22 = vrot.slane %v936_v29, 2 }
 0x16b   :  { %v1136_v37 = vadd.f32 %v1135_v20, %v1134_v4  ;;  %v947_v53 = vadd.f32 %v946_v40, %v945_v55  ;;  %v1145_v2 = vrot.slane %v1144_v13, 4  ;;  %v734_v28 = vmax.f32 %v660_v1, 0.0 }
 0x16c   :  { %v1243_v54 = vmul.f32 0.125, %v1143_v50  ;;  %v733_v21 = vmax.f32 %v655_v17, 0.0  ;;  %v1155_v19 = vadd.f32 %v1154_v23, %v1153_v38  ;;  %v938_v25 = vadd.f32 %v937_v22, %v936_v29 }
 0x16d   :  { %v1242_v15 = vmul.f32 0.125, %v1136_v37  ;;  %v1215_v3 = vmul.f32 0.125, %v947_v53  ;;  %v1146_v58 = vadd.f32 %v1145_v2, %v1144_v13  ;;  %v1165_v7 = vsel %vm737_vm1, %v734_v28, 0.0 }
 0x16e   :  { %v1158_v59 = vsel %vm737_vm1, %v733_v21, 0.0  ;;  %v510_v34 = vadd.f32 %v2383_v36, %v2255_v9  ;;  %v1156_v10 = vrot.slane %v1155_v19, 1  ;;  %v939_v45 = vrot.slane %v938_v25, 1 }
 0x16f   :  { %v1381_v60 = vsel %vm1325_vm2, %v1243_v54, %v1242_v15  ;;  %v1166_v43 = vrot.slane %v1165_v7, 4  ;;  %v1147_v0 = vrot.slane %v1146_v58, 2  ;;  %v1159_v42 = vrot.slane %v1158_v59, 4 }
 0x170   :  { %v704_v56 = vmax.f32 %v510_v34, 0.0  ;;  %v670_v47 = vadd.f32 %v2383_v36, %v2564_v61  ;;  %v1157_v26 = vadd.f32 %v1156_v10, %v1155_v19  ;;  %v940_v18 = vadd.f32 %v939_v45, %v938_v25  ;;  %v2566_v19 = vld [vmem:[#allocation6_spill] sm:$0xff] }
 0x171   :  { %v1167_v27 = vadd.f32 %v1166_v43, %v1165_v7  ;;  %v505_v33 = vadd.f32 %v2383_v36, %v2565_v14  ;;  %v1148_v4 = vadd.f32 %v1147_v0, %v1146_v58  ;;  %v1160_v55 = vadd.f32 %v1159_v42, %v1158_v59 }
 0x172   :  { %v955_v9 = vsel %vm737_vm1, %v704_v56, 0.0  ;;  %v736_v39 = vmax.f32 %v670_v47, 0.0  ;;  %v1245_v24 = vmul.f32 0.125, %v1157_v26  ;;  %v1214_v6 = vmul.f32 0.125, %v940_v18 }
 0x173   :  { %v1168_v12 = vrot.slane %v1167_v27, 2  ;;  %v956_v20 = vrot.slane %v955_v9, 4  ;;  %v1149_v40 = vrot.slane %v1148_v4, 1  ;;  %v1161_v38 = vrot.slane %v1160_v55, 2 }
 0x174   :  { %v1179_v29 = vsel %vm737_vm1, %v736_v39, 0.0  ;;  %v703_v50 = vmax.f32 %v505_v33, 0.0  ;;  %v1356_v13 = vsel %vm1331_vm5, %v1214_v6, %v1355_v46  ;;  %v665_v25 = vadd.f32 %v2383_v36, %v2566_v19 }
 0x175   :  { %v1169_v57 = vadd.f32 %v1168_v12, %v1167_v27  ;;  %v957_v1 = vadd.f32 %v956_v20, %v955_v9  ;;  %v1180_v32 = vrot.slane %v1179_v29, 4  ;;  %v1150_v17 = vadd.f32 %v1149_v40, %v1148_v4 }
 0x176   :  { %v1162_v37 = vadd.f32 %v1161_v38, %v1160_v55  ;;  %v948_v53 = vsel %vm737_vm1, %v703_v50, 0.0  ;;  %v2466_v23 = vsel %vm1333_vm6, %v1215_v3, %v1356_v13  ;;  %v520_v46 = vadd.f32 %v2383_v36, %v2274_v8 }
 0x177   :  { %v1170_v22 = vrot.slane %v1169_v57, 1  ;;  %v958_v54 = vrot.slane %v957_v1, 2  ;;  %v1181_v2 = vadd.f32 %v1180_v32, %v1179_v29  ;;  %v949_v28 = vrot.slane %v948_v53, 4 }
 0x178   :  { %v1244_v21 = vmul.f32 0.125, %v1150_v17  ;;  %v1163_v15 = vrot.slane %v1162_v37, 1  ;;  %v735_v45 = vmax.f32 %v665_v25, 0.0  ;;  %v706_v43 = vmax.f32 %v520_v46, 0.0 }
 0x179   :  { %v1171_v58 = vadd.f32 %v1170_v22, %v1169_v57  ;;  %v959_v7 = vadd.f32 %v958_v54, %v957_v1  ;;  %v1182_v59 = vrot.slane %v1181_v2, 2  ;;  %v950_v34 = vadd.f32 %v949_v28, %v948_v53 }
 0x17a   :  { %v1382_v10 = vsel %vm1327_vm3, %v1244_v21, %v1381_v60  ;;  %v1164_v3 = vadd.f32 %v1163_v15, %v1162_v37  ;;  %v1233_v0 = vmul.f32 0.125, %v2424_v51  ;;  %v1172_v18 = vsel %vm737_vm1, %v735_v45, 0.0 }
 0x17b   :  { %v1247_v42 = vmul.f32 0.125, %v1171_v58  ;;  %v1383_v56 = vsel %vm1329_vm4, %v1245_v24, %v1382_v10  ;;  %v1183_v61 = vadd.f32 %v1182_v59, %v1181_v2  ;;  %v951_v26 = vrot.slane %v950_v34, 2  ;;  %v2567_v2 = vld [vmem:[#allocation8_spill] sm:$0xff]  ;;  %v2570_v10 = vld [vmem:[#allocation9_spill] sm:$0xff] }
 0x17c   :  { %v1246_v47 = vmul.f32 0.125, %v1164_v3  ;;  %v969_v8 = vsel %vm737_vm1, %v706_v43, 0.0  ;;  %v1241_v27 = vmul.f32 0.125, %v2435_v44  ;;  %v960_v14 = vrot.slane %v959_v7, 1 }
 0x17d   :  { %v1173_v33 = vrot.slane %v1172_v18, 4  ;;  %v970_v60 = vrot.slane %v969_v8, 4  ;;  %v952_v55 = vadd.f32 %v951_v26, %v950_v34  ;;  %v515_v51 = vadd.f32 %v2383_v36, %v2278_v35 }
 0x17e   :  { %v1384_v4 = vsel %vm1331_vm5, %v1246_v47, %v1383_v56  ;;  %v1352_v9 = vsel %vm1337_vm8, %v2355_v52, %v2363_v30  ;;  %v1006_v39 = vadd.f32 %v1005_v41, %v2300_v63  ;;  %v1184_v24 = vrot.slane %v1183_v61, 1 }
 0x17f   :  { %v1174_v6 = vadd.f32 %v1173_v33, %v1172_v18  ;;  %v1385_v44 = vsel %vm1333_vm6, %v1247_v42, %v1384_v4  ;;  %v953_v12 = vrot.slane %v952_v55, 1  ;;  %v971_v20 = vadd.f32 %v970_v60, %v969_v8 }
 0x180   :  { %v705_v40 = vmax.f32 %v515_v51, 0.0  ;;  %v2490_v38 = vsel %vm1337_vm8, %v1233_v0, %v2371_v11  ;;  %v961_v35 = vadd.f32 %v960_v14, %v959_v7  ;;  %v2494_v52 = vsel %vm1337_vm8, %v1241_v27, %v2444_v5 }
 0x181   :  { %v1175_v36 = vrot.slane %v1174_v6, 2  ;;  %v954_v30 = vadd.f32 %v953_v12, %v952_v55  ;;  %v972_v29 = vrot.slane %v971_v20, 2  ;;  %v1794_v13 = vmov 0.0  }
 0x182   :  { %v962_v63 = vsel %vm737_vm1, %v705_v40, 0.0  ;;  %1757 = vmatprep.mubr.msk.f32.mxu1 %vm1793_vm10, %v1794_v13  ;;  %v10_v11 = vstv %s2544_s4  ;;  %v1007_v57 = vrot.slane %v1006_v39, 2  ;;  %v1185_v1 = vadd.f32 %v1184_v24, %v1183_v61 }
 0x183   :  { %v1176_v41 = vadd.f32 %v1175_v36, %v1174_v6  ;;  %v963_v50 = vrot.slane %v962_v63, 4  ;;  %v1216_v32 = vmul.f32 0.125, %v954_v30  ;;  %v973_v17 = vadd.f32 %v972_v29, %v971_v20  ;;  %11 = vst [vmem:[#allocation2] sm:$0x1] %v10_v11 }
 0x184   :  { %v1795_v37 = vmov 0   ;;  %v1014_v5 = vrot.slane %v2343_v49, 2  ;;  %v1217_v53 = vmul.f32 0.125, %v961_v35  ;;  %v988_v28 = vrot.slane %v2567_v2, 1 }
 0x185   :  { %1786 = vset.pattern.permute.xlu0 %v1795_v37  ;;  %v1177_v22 = vrot.slane %v1176_v41, 1  ;;  %v964_v54 = vadd.f32 %v963_v50, %v962_v63  ;;  %v2568_v21 = vrot.slane %v2280_v16, 2  ;;  %v1358_v19 = vsel %vm1335_vm7, %v1216_v32, %v2466_v23 }
 0x186   :  { %v974_v25 = vrot.slane %v973_v17, 1  ;;  %v2569_v46 = vrot.slane %v2252_v31, 2  ;;  %v1359_v34 = vsel %vm1337_vm8, %v1217_v53, %v1358_v19  ;;  %v981_v3 = vrot.slane %v2570_v10, 1 }
 0x187   :  { %v994_v15 = vadd.f32 %v2568_v21, %v2280_v16  ;;  %v1178_v7 = vadd.f32 %v1177_v22, %v1176_v41  ;;  %v965_v59 = vrot.slane %v964_v54, 2  ;;  %v1008_v45 = vadd.f32 %v1007_v57, %v1006_v39  ;;  %v1250_v57 = vld [vmem:[%s2545_s3] sm:$0x1] }
 0x188   :  { %v1001_v58 = vadd.f32 %v2569_v46, %v2252_v31  ;;  %v1249_v43 = vmul.f32 0.125, %v1185_v1  ;;  %v1769_v0 = vpack.c.bf16 %v1359_v34, %v1352_v9  ;;  %v1015_v42 = vadd.f32 %v1014_v5, %v2343_v49 }
 0x189   :  { %v1248_v16 = vmul.f32 0.125, %v1178_v7  ;;  %v975_v56 = vadd.f32 %v974_v25, %v973_v17  ;;  %v966_v61 = vadd.f32 %v965_v59, %v964_v54  ;;  %v995_v23 = vrot.slane %v994_v15, 1 }
 0x18a   :  { %1771 = vmatpush3.bf16.xpose.msk.msra.mxu1 %vm2408_vm9, %v1769_v0  ;;  %v1002_v47 = vrot.slane %v1001_v58, 1  ;;  %v1251_v18 = vld [vmem:[#allocation2] sm:$0x1]  ;;  %v989_v8 = vadd.f32 %v988_v28, %v2567_v2  ;;  %v982_v27 = vadd.f32 %v981_v3, %v2570_v10  ;;  %v1009_v14 = vrot.slane %v1008_v45, 1 }
 0x18b   :  { %v1386_v31 = vsel %vm1335_vm7, %v1248_v16, %v1385_v44  ;;  %v967_v26 = vrot.slane %v966_v61, 1  ;;  %1772 = vmatprep.subr.bf16.mxu1 %v2561_v48  ;;  %1254 = vperm.xlu0 %1786, %v1251_v18   ;;  %v1016_v33 = vrot.slane %v1015_v42, 1  ;;  %v1219_v60 = vmul.f32 0.125, %v975_v56 }
 0x18c   :  { %v1387_v49 = vsel %vm1337_vm8, %v1249_v43, %v1386_v31  ;;  %v996_v51 = vadd.f32 %v995_v23, %v994_v15  ;;  %v1003_v9 = vadd.f32 %v1002_v47, %v1001_v58  ;;  %v1220_v24 = vmul.f32 0.125, %v982_v27 }
 0x18d   :  { %v968_v4 = vadd.f32 %v967_v26, %v966_v61  ;;  %v1777_v55 = vpack.c.bf16 %v1387_v49, %v2494_v52  ;;  %v1010_v6 = vadd.f32 %v1009_v14, %v1008_v45  ;;  %v1221_v44 = vmul.f32 0.125, %v989_v8 }
 0x18e   :  { %v1017_v12 = vadd.f32 %v1016_v33, %v1015_v42  ;;  %v1222_v40 = vmul.f32 0.125, %v996_v51  ;;  %v1223_v36 = vmul.f32 0.125, %v1003_v9  ;;  %v1257_v1 = vlaneseq }
 0x18f   :  { %v1218_v39 = vmul.f32 0.125, %v968_v4  ;;  %v1224_v29 = vmul.f32 0.125, %v1010_v6 }
 0x190   :  { %v1225_v41 = vmul.f32 0.125, %v1017_v12  ;;  %v1258_v32 = vshrl.u32 %v1257_v1, 7 }
 0x191   :  { %v1360_v20 = vsel %vm1325_vm2, %v1219_v60, %v1218_v39 }
 0x192   :  { %v1361_v35 = vsel %vm1327_vm3, %v1220_v24, %v1360_v20  ;;  %v1259_v17 = vsub.s32 0, %v1258_v32 }
 0x193   :  { %v1362_v30 = vsel %vm1329_vm4, %v1221_v44, %v1361_v35 }
 0x194   :  { %v1363_v63 = vsel %vm1331_vm5, %v1222_v40, %v1362_v30 }
 0x195   :  { %v1364_v52 = vsel %vm1333_vm6, %v1223_v36, %v1363_v63 }
 0x196   :  { %v1365_v50 = vsel %vm1335_vm7, %v1224_v29, %v1364_v52 }
 0x197   :  { %v1366_v13 = vsel %vm1337_vm8, %v1225_v41, %v1365_v50 }
 0x198   :  { %v1773_v11 = vpack.c.bf16 %v2490_v38, %v1366_v13 }
 0x19a   :  { %1775 = vmatpush3.bf16.xpose.msk.msra.mxu1 %vm2408_vm9, %v1773_v11 }
 0x19b   :  { %1776 = vmatprep.subr.bf16.mxu1 %v2561_v48 }
 0x1a2   :  { %1779 = vmatpush3.bf16.xpose.msk.msra.mxu1 %vm2408_vm9, %v1777_v55 }
 0x1a9   :  { %1758 = vmatmul.mubr.msk.f32.vlgmr.msra.gmra.mrb[30].mxu1 %vm737_vm1, %v1250_v57 }
 0x20a   :  { %v1255_v37 = vpop.permute.xlu0 %1254 }
 0x20b   :  { %v1260_v5 = vrot.slane %v1255_v37, %v1259_v17 }
 0x27c   :  { %v1473_v38 = vpop.f32.mrb[30].mxu1 }
 0x27d   :  { %v1474_v53 = vadd.f32 %v1473_v38, %v1260_v5  ;;  %v1759_v22 = vpop.f32.mrb[31].mxu1 }
 0x27f   :  { %v1477_v54 = vand.u32 2147483647, %v1474_v53  ;;  %vm1481_vm11 = vcmp.ge.f32.partialorder %v1474_v53, 0.0 }
 0x281   :  { %v1478_v2 = vsub.f32 0.0, %v1477_v54 }
 0x283   :  { %v1479_v48 = vmul.f32 1.442695, %v1478_v2 }
 0x285   :  { %1787 = vpow2.f32 %v1479_v48 }
 0x28f   :  { %v1788_v62 = vpop.eup %1787 }
 0x290   :  { %v1483_v28 = vadd.f32 1.0, %v1788_v62  ;;  %v1482_v15 = vsel %vm1481_vm11, 1.0, %v1788_v62 }
 0x292   :  { %1789 = vrcp.f32 %v1483_v28 }
 0x29c   :  { %v1790_v21 = vpop.eup %1789 }
 0x29d   :  { %v1485_v19 = vmul.f32 %v1790_v21, %v1482_v15 }
 0x29f   :  { %1487 = vst.msk [vmem:[%s2546_s5] sm:$0x1] %vm1486_vm12, %v1485_v19 }

</bundles_post_ra>
